<compile_context>
chip_gen: v7x
topology: tpu7x:2x2x1
jax: 0.10.0
libtpu: 0.0.40
codegen_flags: <defaults>
</compile_context>

<pallas_src>
import functools

import jax
import jax.numpy as jnp
from jax import lax
from jax.experimental import pallas as pl
from jax.experimental.pallas import tpu as pltpu


_VMEM_LIMIT = 32 * 1024 * 1024   # fits default scoped VMEM on v5e/v6e/v7x


def _round_up(x, m):
    return (x + m - 1) // m * m


# ---------------------------------------------------------------------------
# Tiled matmul + bias + activation (MXU), f32 accumulation in VMEM scratch.
# grid = (row_tiles, k_tiles); K is the reduction ("arbitrary", last) axis.
# ---------------------------------------------------------------------------
def _matmul_kernel(x_ref, w_ref, b_ref, o_ref, acc_ref, *, activation):
    @pl.when(pl.program_id(1) == 0)
    def _():
        acc_ref[...] = jnp.zeros_like(acc_ref)

    acc_ref[...] += jnp.dot(x_ref[...], w_ref[...],
                            preferred_element_type=jnp.float32)

    @pl.when(pl.program_id(1) == pl.num_programs(1) - 1)
    def _():
        y = acc_ref[...] + b_ref[...].astype(jnp.float32)
        if activation == "leaky_relu":        # F.leaky_relu default slope 0.01
            y = jnp.where(y > 0, y, 0.01 * y)
        elif activation == "relu":
            y = jnp.maximum(y, 0.0)
        o_ref[...] = y.astype(o_ref.dtype)


def pallas_matmul_bias_act(x, w, b, activation="none", *,
                           tm=512, tk=512, out_dtype=jnp.float32):
    n, k = x.shape
    k2, m = w.shape
    assert k == k2, (k, k2)

    # K padding: small contractions (conv1: 5*5*4 = 100) are rounded to a full
    # 128-wide MXU pass; larger ones only to the bf16 sublane multiple.
    k_p = 128 if k <= 128 else _round_up(k, 16)
    tk = min(tk, k_p)
    k_p = _round_up(k_p, tk)

    # Row padding to the row-tile size (zero rows are numerically neutral).
    n_p = _round_up(n, 16)
    tm = min(tm, n_p)
    n_p = _round_up(n_p, tm)

    if n_p != n or k_p != k:
        x = jnp.pad(x, ((0, n_p - n), (0, k_p - k)))
    if k_p != k:
        w = jnp.pad(w, ((0, k_p - k), (0, 0)))
    b2 = b.reshape(1, m).astype(jnp.float32)

    grid = (n_p // tm, k_p // tk)
    cost = pl.CostEstimate(
        flops=2 * n_p * k_p * m,
        transcendentals=0,
        bytes_accessed=(x.size * x.dtype.itemsize + w.size * w.dtype.itemsize
                        + b2.size * 4 + n_p * m * 4))

    out = pl.pallas_call(
        functools.partial(_matmul_kernel, activation=activation),
        out_shape=jax.ShapeDtypeStruct((n_p, m), out_dtype),
        grid_spec=pltpu.PrefetchScalarGridSpec(
            num_scalar_prefetch=0,
            grid=grid,
            in_specs=[pl.BlockSpec((tm, tk), lambda i, kk: (i, kk)),
                      pl.BlockSpec((tk, m), lambda i, kk: (kk, 0)),
                      pl.BlockSpec((1, m), lambda i, kk: (0, 0))],
            out_specs=pl.BlockSpec((tm, m), lambda i, kk: (i, 0)),
            scratch_shapes=[pltpu.VMEM((tm, m), jnp.float32)]),
        compiler_params=pltpu.CompilerParams(
            dimension_semantics=("parallel", "arbitrary"),
            vmem_limit_bytes=_VMEM_LIMIT),
        cost_estimate=cost,
    )(x, w, b2)
    return out[:n]


# ---------------------------------------------------------------------------
# 3x3/stride-2 max-pool (over 9 pre-gathered taps) + ReLU, gridded over rows.
# ---------------------------------------------------------------------------
def _maxpool_relu_kernel(w_ref, o_ref):
    m = jnp.max(w_ref[...], axis=0)                        # max over 9 taps
    o_ref[...] = jnp.maximum(m, 0.0).astype(o_ref.dtype)   # relu(max_pool(.))


def pallas_maxpool_relu(wins, *, tn=1024):
    kk, n, c = wins.shape
    n_p = _round_up(n, 8)
    tn = min(tn, n_p)
    n_p = _round_up(n_p, tn)
    if n_p != n:
        wins = jnp.pad(wins, ((0, 0), (0, n_p - n), (0, 0)))
    out = pl.pallas_call(
        _maxpool_relu_kernel,
        out_shape=jax.ShapeDtypeStruct((n_p, c), wins.dtype),
        grid_spec=pltpu.PrefetchScalarGridSpec(
            num_scalar_prefetch=0,
            grid=(n_p // tn,),
            in_specs=[pl.BlockSpec((kk, tn, c), lambda i: (0, i, 0))],
            out_specs=pl.BlockSpec((tn, c), lambda i: (i, 0))),
        compiler_params=pltpu.CompilerParams(
            dimension_semantics=("parallel",),
            vmem_limit_bytes=_VMEM_LIMIT),
    )(wins)
    return out[:n]


# ---------------------------------------------------------------------------
# Fused linear tail: lin1 -> leaky -> lin2 -> leaky -> lin3, one pallas_call.
# All weights stay resident in VMEM; final store is lane-dense (padded to 128).
# ---------------------------------------------------------------------------
def _mlp_head_kernel(x_ref, w1_ref, b1_ref, w2_ref, b2_ref, w3_ref, b3_ref,
                     o_ref):
    def leaky(z):
        return jnp.where(z > 0, z, 0.01 * z)

    h = jnp.dot(x_ref[...], w1_ref[...], preferred_element_type=jnp.float32)
    h = leaky(h + b1_ref[...])
    h = jnp.dot(h, w2_ref[...], preferred_element_type=jnp.float32)
    h = leaky(h + b2_ref[...])
    y = jnp.dot(h, w3_ref[...], preferred_element_type=jnp.float32)
    o_ref[...] = (y + b3_ref[...]).astype(o_ref.dtype)


def pallas_mlp_head(feat, params, num_actions, *, tm=256):
    n, k = feat.shape
    w1, b1 = params["lin1_w"], params["lin1_b"]
    w2, b2 = params["lin2_w"], params["lin2_b"]
    w3, b3 = params["lin3_w"], params["lin3_b"]
    d1, d2 = w1.shape[1], w2.shape[1]

    # Lane-dense final output: pad num_actions up to 128 lanes, slice after.
    m_pad = _round_up(max(num_actions, 128), 128)
    w3p = jnp.pad(w3, ((0, 0), (0, m_pad - w3.shape[1])))
    b3p = jnp.pad(b3, (0, m_pad - b3.shape[0]))

    n_p = _round_up(n, 8)
    tm = min(tm, n_p)
    n_p = _round_up(n_p, tm)
    if n_p != n:
        feat = jnp.pad(feat, ((0, n_p - n), (0, 0)))

    cost = pl.CostEstimate(
        flops=2 * n_p * (k * d1 + d1 * d2 + d2 * m_pad),
        transcendentals=0,
        bytes_accessed=(feat.size * 4 + (w1.size + w2.size + w3p.size) * 4
                        + n_p * m_pad * 4))

    out = pl.pallas_call(
        _mlp_head_kernel,
        out_shape=jax.ShapeDtypeStruct((n_p, m_pad), jnp.float32),
        grid_spec=pltpu.PrefetchScalarGridSpec(
            num_scalar_prefetch=0,
            grid=(n_p // tm,),
            in_specs=[pl.BlockSpec((tm, k), lambda i: (i, 0)),
                      pl.BlockSpec((k, d1), lambda i: (0, 0)),
                      pl.BlockSpec((1, d1), lambda i: (0, 0)),
                      pl.BlockSpec((d1, d2), lambda i: (0, 0)),
                      pl.BlockSpec((1, d2), lambda i: (0, 0)),
                      pl.BlockSpec((d2, m_pad), lambda i: (0, 0)),
                      pl.BlockSpec((1, m_pad), lambda i: (0, 0))],
            out_specs=pl.BlockSpec((tm, m_pad), lambda i: (i, 0))),
        compiler_params=pltpu.CompilerParams(
            dimension_semantics=("parallel",),
            vmem_limit_bytes=_VMEM_LIMIT),
        cost_estimate=cost,
    )(feat, w1, b1.reshape(1, d1), w2, b2.reshape(1, d2),
      w3p, b3p.reshape(1, m_pad))
    return out[:n, :num_actions]


# ---------------------------------------------------------------------------
# Conv block: conv(k, pad=1) -> max_pool2d(3, stride=2) -> relu
# ---------------------------------------------------------------------------
def conv_pool_relu(x, w, b):
    # x: (B, H, W, Cin) NHWC; w: (k, k, Cin, Cout) HWIO; pad = 1, stride = 1
    batch, h, wd, cin = x.shape
    k = w.shape[0]
    cout = w.shape[-1]

    xp = jnp.pad(x, ((0, 0), (1, 1), (1, 1), (0, 0)))
    ho, wo = h + 2 - k + 1, wd + 2 - k + 1

    # im2col glue: (kh, kw, cin) feature ordering matches w.reshape below.
    # TODO(synk): drive the conv as a shifted-window matmul (kh/kw grid axes)
    # and fuse the 3x3/s2 max-pool into the matmul epilogue so the k^2 im2col
    # copy and the 9x pooling-tap copy never round-trip HBM.
    cols = []
    for kh in range(k):
        for kw in range(k):
            cols.append(xp[:, kh:kh + ho, kw:kw + wo, :])
    patches = jnp.stack(cols, axis=3).reshape(batch * ho * wo, k * k * cin)

    # bf16 MXU inputs, f32 accumulation.
    y = pallas_matmul_bias_act(
        patches.astype(jnp.bfloat16),
        w.reshape(k * k * cin, cout).astype(jnp.bfloat16),
        b, "none", out_dtype=jnp.float32)
    y = y.reshape(batch, ho, wo, cout)

    # max_pool2d(kernel=3, stride=2, padding=0): gather the 9 strided taps.
    hp, wp = (ho - 3) // 2 + 1, (wo - 3) // 2 + 1
    wins = []
    for ph in range(3):
        for pw in range(3):
            wins.append(y[:, ph:ph + 2 * hp - 1:2, pw:pw + 2 * wp - 1:2, :])
    wins = jnp.stack(wins, axis=0).reshape(9, batch * hp * wp, cout)

    out = pallas_maxpool_relu(wins)
    return out.reshape(batch, hp, wp, cout)


# ---------------------------------------------------------------------------
# Full DQN forward (matches torch DQN.forward)
# ---------------------------------------------------------------------------
def dqn_forward(states, params, num_actions):
    # states: (B, C, H, W) float32, same as the PyTorch NCHW input
    x = jnp.transpose(states, (0, 2, 3, 1))  # -> NHWC
    x = conv_pool_relu(x, params["conv1_w"], params["conv1_b"])
    x = conv_pool_relu(x, params["conv2_w"], params["conv2_b"])
    x = conv_pool_relu(x, params["conv3_w"], params["conv3_b"])
    batch = x.shape[0]
    # torch flattens NCHW -> (B, C*H*W); permute back so feature order matches.
    feat = jnp.transpose(x, (0, 3, 1, 2)).reshape(batch, -1)
    return pallas_mlp_head(feat, params, num_actions)


# ---------------------------------------------------------------------------
# Pure-JAX reference (XLA conv / reduce_window) for validation
# ---------------------------------------------------------------------------
def ref_forward(states, params):
    h = jnp.transpose(states, (0, 2, 3, 1))
    for w, b in [(params["conv1_w"], params["conv1_b"]),
                 (params["conv2_w"], params["conv2_b"]),
                 (params["conv3_w"], params["conv3_b"])]:
        h = lax.conv_general_dilated(
            h, w, window_strides=(1, 1), padding=[(1, 1), (1, 1)],
            dimension_numbers=("NHWC", "HWIO", "NHWC")) + b
        h = lax.reduce_window(h, -jnp.inf, lax.max,
                              (1, 3, 3, 1), (1, 2, 2, 1), "VALID")
        h = jnp.maximum(h, 0.0)
    batch = h.shape[0]
    feat = jnp.transpose(h, (0, 3, 1, 2)).reshape(batch, -1)

    def leaky(z):
        return jnp.where(z > 0, z, 0.01 * z)

    h = leaky(feat @ params["lin1_w"] + params["lin1_b"])
    h = leaky(h @ params["lin2_w"] + params["lin2_b"])
    return h @ params["lin3_w"] + params["lin3_b"]


# ---------------------------------------------------------------------------
# Parameter setup (deterministic, synthetic; mirrors nn.Module shapes)
# ---------------------------------------------------------------------------
def conv_trunk_shape(input_shape):
    c, h, w = input_shape
    for k, cout in ((5, 32), (3, 32), (3, 64)):
        h = h + 2 - k + 1
        w = w + 2 - k + 1
        h = (h - 3) // 2 + 1
        w = (w - 3) // 2 + 1
        c = cout
    return c, h, w


def init_params(key, in_channels, num_actions, conv_out_size):
    ks = jax.random.split(key, 12)

    def rnd(k, shape, scale=0.05):
        return (scale * jax.random.normal(k, shape)).astype(jnp.float32)

    return {
        # conv weights stored in HWIO (== torch OIHW transposed (2,3,1,0))
        "conv1_w": rnd(ks[0], (5, 5, in_channels, 32)),
        "conv1_b": rnd(ks[1], (32,)),
        "conv2_w": rnd(ks[2], (3, 3, 32, 32)),
        "conv2_b": rnd(ks[3], (32,)),
        "conv3_w": rnd(ks[4], (3, 3, 32, 64)),
        "conv3_b": rnd(ks[5], (64,)),
        # linear weights stored as (in, out) (== torch weight.T)
        "lin1_w": rnd(ks[6], (conv_out_size, 256)),
        "lin1_b": rnd(ks[7], (256,)),
        "lin2_w": rnd(ks[8], (256, 256)),
        "lin2_b": rnd(ks[9], (256,)),
        "lin3_w": rnd(ks[10], (256, num_actions)),
        "lin3_b": rnd(ks[11], (num_actions,)),
    }


if __name__ == "__main__":
    key = jax.random.PRNGKey(0)
    input_shape = (4, 32, 32)   # (C, H, W) — smallest spatial surviving 3 pools
    num_actions = 6
    batch = 2

    c, hh, ww = conv_trunk_shape(input_shape)
    conv_out_size = c * hh * ww   # == DQN._get_conv_output = 64*2*2 = 256

    k_param, k_x = jax.random.split(key)
    params = init_params(k_param, input_shape[0], num_actions, conv_out_size)
    states = jax.random.normal(k_x, (batch,) + input_shape, dtype=jnp.float32)

    out = jax.block_until_ready(dqn_forward(states, params, num_actions))
    ref = jax.block_until_ready(ref_forward(states, params))

    assert out.shape == (batch, num_actions), out.shape
    # convs use bf16 MXU inputs (f32 accumulation) -> slightly looser tolerance
    assert jnp.allclose(out, ref, atol=1e-2, rtol=2e-2), (
        float(jnp.max(jnp.abs(out - ref))))
    print("KERNEL_OK")
</pallas_src>

<mosaic_0001>
module attributes {stable_mosaic.version = 11 : i64} {
  func.func @_matmul_kernel(%arg0: i32, %arg1: i32, %arg2: memref<512x128xbf16, #tpu.memory_space<vmem>>, %arg3: memref<128x32xbf16, #tpu.memory_space<vmem>>, %arg4: memref<1x32xf32, #tpu.memory_space<vmem>>, %arg5: memref<512x32xf32, #tpu.memory_space<vmem>>, %arg6: memref<512x32xf32, #tpu.memory_space<vmem>>) attributes {dimension_semantics = [#tpu.dimension_semantics<parallel>, #tpu.dimension_semantics<arbitrary>], iteration_bounds = array<i64: 4, 1>, scalar_prefetch = 0 : i64, scratch_operands = 1 : i64, tpu.core_type = #tpu.core_type<tc>, window_params = [{transform_indices = @transform_0, window_bounds = array<i64: 512, 128>}, {transform_indices = @transform_1, window_bounds = array<i64: 128, 32>}, {pipeline_mode = #tpu.pipeline_mode<synchronous>, transform_indices = @transform_2, window_bounds = array<i64: 1, 32>}, {transform_indices = @transform_3, window_bounds = array<i64: 512, 32>}]} {
    %c0_i32 = arith.constant 0 : i32
    %0 = arith.cmpi eq, %arg1, %c0_i32 : i32
    %1 = arith.extui %0 : i1 to i32
    %c0_i32_0 = arith.constant 0 : i32
    %2 = arith.cmpi ne, %1, %c0_i32_0 : i32
    scf.if %2 {
      %cst_10 = arith.constant 0.000000e+00 : f32
      %12 = vector.broadcast %cst_10 : f32 to vector<512x32xf32>
      %c0_11 = arith.constant 0 : index
      %c0_12 = arith.constant 0 : index
      %13 = vector.load %arg6[%c0_11, %c0_12] : memref<512x32xf32, #tpu.memory_space<vmem>>, vector<512x32xf32>
      tpu.vector_store %arg6[%c0_11, %c0_12], %12 {strides = array<i32>} : memref<512x32xf32, #tpu.memory_space<vmem>>, vector<512x32xf32>,
    } else {
    }
    %c0 = arith.constant 0 : index
    %c0_1 = arith.constant 0 : index
    %3 = vector.load %arg6[%c0, %c0_1] : memref<512x32xf32, #tpu.memory_space<vmem>>, vector<512x32xf32>
    %c0_2 = arith.constant 0 : index
    %c0_3 = arith.constant 0 : index
    %4 = vector.load %arg2[%c0_2, %c0_3] : memref<512x128xbf16, #tpu.memory_space<vmem>>, vector<512x128xbf16>
    %c0_4 = arith.constant 0 : index
    %c0_5 = arith.constant 0 : index
    %5 = vector.load %arg3[%c0_4, %c0_5] : memref<128x32xbf16, #tpu.memory_space<vmem>>, vector<128x32xbf16>
    %cst = arith.constant dense<0.000000e+00> : vector<512x32xf32>
    %6 = tpu.matmul %4, %5, %cst {dimension_numbers = #tpu.dot_dimension_numbers<[1], [0], [0], [1], [0, 0, 1, 1], [], []>} : vector<512x128xbf16>, vector<128x32xbf16>, vector<512x32xf32> -> vector<512x32xf32>
    %7 = arith.addf %3, %6 : vector<512x32xf32>
    %c0_6 = arith.constant 0 : index
    %c0_7 = arith.constant 0 : index
    %8 = vector.load %arg6[%c0_6, %c0_7] : memref<512x32xf32, #tpu.memory_space<vmem>>, vector<512x32xf32>
    tpu.vector_store %arg6[%c0_6, %c0_7], %7 {strides = array<i32>} : memref<512x32xf32, #tpu.memory_space<vmem>>, vector<512x32xf32>,
    %c0_i32_8 = arith.constant 0 : i32
    %9 = arith.cmpi eq, %arg1, %c0_i32_8 : i32
    %10 = arith.extui %9 : i1 to i32
    %c0_i32_9 = arith.constant 0 : i32
    %11 = arith.cmpi ne, %10, %c0_i32_9 : i32
    scf.if %11 {
      %c0_10 = arith.constant 0 : index
      %c0_11 = arith.constant 0 : index
      %12 = vector.load %arg6[%c0_10, %c0_11] : memref<512x32xf32, #tpu.memory_space<vmem>>, vector<512x32xf32>
      %c0_12 = arith.constant 0 : index
      %c0_13 = arith.constant 0 : index
      %13 = vector.load %arg4[%c0_12, %c0_13] : memref<1x32xf32, #tpu.memory_space<vmem>>, vector<1x32xf32>
      %14 = vector.broadcast %13 : vector<1x32xf32> to vector<512x32xf32>
      %15 = arith.addf %12, %14 : vector<512x32xf32>
      %c0_14 = arith.constant 0 : index
      %c0_15 = arith.constant 0 : index
      %16 = vector.load %arg5[%c0_14, %c0_15] : memref<512x32xf32, #tpu.memory_space<vmem>>, vector<512x32xf32>
      tpu.vector_store %arg5[%c0_14, %c0_15], %15 {strides = array<i32>} : memref<512x32xf32, #tpu.memory_space<vmem>>, vector<512x32xf32>,
    } else {
    }
    return
  }
  func.func @transform_0(%arg0: i32, %arg1: i32) -> (i32, i32) {
    %c0_i32 = arith.constant 0 : i32
    return %arg0, %arg1 : i32, i32
  }
  func.func @transform_1(%arg0: i32, %arg1: i32) -> (i32, i32) {
    %c0_i32 = arith.constant 0 : i32
    %c0_i32_0 = arith.constant 0 : i32
    return %arg1, %c0_i32 : i32, i32
  }
  func.func @transform_2(%arg0: i32, %arg1: i32) -> (i32, i32) {
    %c0_i32 = arith.constant 0 : i32
    %c0_i32_0 = arith.constant 0 : i32
    %c0_i32_1 = arith.constant 0 : i32
    return %c0_i32, %c0_i32_0 : i32, i32
  }
  func.func @transform_3(%arg0: i32, %arg1: i32) -> (i32, i32) {
    %c0_i32 = arith.constant 0 : i32
    %c0_i32_0 = arith.constant 0 : i32
    return %arg0, %c0_i32 : i32, i32
  }
}

</mosaic_0001>

<bundles_post_ra>
// kernel: tpu_custom_call.1
= control target key start
LH: loop header
LB: loop body
LE: loop exit
PB: predicated region body
PF: predicated region fallthrough
CT: control target
= control target key end

     0   :  { %8 = vsyncpa [#allocation4], 0  ;;  %s2374_s0 = inlined_call_operand.hbm [shape: bf16[2048,128], index: 0, kind: input, shape index: {}]   ;;  %s2375_s1 = inlined_call_operand.vmem [shape: bf16[128,32], index: 1, kind: input, shape index: {}]   ;;  %s2376_s2 = inlined_call_operand.vmem [shape: f32[1,32], index: 2, kind: input, shape index: {}]   ;;  %s2377_s3 = inlined_call_operand.vmem [shape: f32[2048,32], index: 3, kind: output, shape index: {}]  }
   0x1   :  { %10 = vsyncpa [#allocation4 + $0x1], 0  ;;  %s1793_s12 = smov 0   ;;  %s1795_s13 = smov 0  }
   0x2   :  { %s1797_s14 = smov 0   ;;  %s1799_s15 = smov 0  }
   0x3   :  { %s1801_s16 = smov 0   ;;  %s1803_s17 = smov 0  }
   0x4 LB: > { %s1397_s18 = sadd.s32 4294967295, %s1767_s17   ;;  %s28_s19 = sadd.s32 1, %s1763_s16  ;;  %s1767_s17 = sphi %s1803_s17, %s16_s17   ;;  %s1763_s16 = sphi %s1801_s16, %s2386_s16   ;;  %s1759_s15 = sphi %s1799_s15, %s2385_s15   ;;  %s1755_s14 = sphi %s1797_s14, %s2384_s14   ;;  %s1751_s13 = sphi %s1795_s13, %s2383_s13   ;;  %s1747_s12 = sphi %s1793_s12, %s2382_s12  }
   0x5   : > { %p30_p0 = scmp.ge.s32.totalorder %s28_s19, 4  ;;  %s37_s20 = sadd.s32 1, %s1755_s14 }
   0x6   : > { %p44_p1 = scmp.ne.s32.totalorder %s1755_s14, %s1751_s13  ;;  %p45_p2 = scmp.eq.s32.totalorder %s1767_s17, 0 }
   0x7   : > { %s2388_s19 = smov (%p30_p0, %s28_s19), 0  ;;  %p50_p4 = scmp.ne.s32.totalorder %s1751_s13, %s1747_s12 }
   0x8   : > { %p1829_p3 = por %p45_p2, %p44_p1  ;;  %s32_s22 = ssub.s32 %s1763_s16, %s2388_s19 }
   0x9   : > { %p51_p5 = scmp.eq.s32.totalorder %s1397_s18, 0  ;;  %p35_p6 = scmp.eq.s32.totalorder %s32_s22, 0 }
   0xa   : > { %p1595_p8 = scmp.lt.s32.totalorder %s1767_s17, 4  ;;  %s159_s25 = sand.u32 1, %s1755_s14  }
   0xb   : > { %p1836_p7 = por %p51_p5, %p50_p4  ;;  %s1452_s26 = sshll.u32 %s1763_s16, 12 }
   0xc   : > { %s1842_s24 = scalar_select %p35_p6, %s1755_s14, %s37_s20  }
   0xd   : > { %s1402_s27 = sshll.u32 %s159_s25, 8  ;;  %s1849_s30 = scalar_lea.hbm %s2374_s0, %s1452_s26 }
   0xe   : > { %s163_s4 = scalar_lea.vmem [#allocation3], %s1402_s27  ;;  %p1853_p9 = pnand %p1595_p8, %p1829_p3 }
   0xf   : > { %s171_s5 = sshll.u32 %s163_s4, 4  ;;  %s1859_s7 = scalar_lea.sflag [#allocation4], %s159_s25  ;;  %s1857_s5 = int_to_ptr.vmem [resolvable:$true] %s171_s5 }
  0x10   : > { %s1687_s8 = scalar_lea.hbm %s1849_s30, 4096  ;;  %p1689_p11 = pneg %p1853_p9 }
  0x11   : > { %p1688_p10 = scmp.ne.s32.totalorder %s1849_s30, %s1687_s8  ;;  %s1692_s11 = scalar_lea.hbm %s2374_s0, 16384 }
  0x12   : > { %p1693_p0 = scmp.lt.u32.totalorder %s1849_s30, %s2374_s0  ;;  %p1694_p1 = scmp.lt.u32.totalorder %s1692_s11, %s1687_s8 }
  0x13   : > { %p1690_p12 = pnand %p1689_p11, %p1688_p10  ;;  %p1696_p3 = scmp.lt.u32.totalorder %s1687_s8, %s1849_s30 }
  0x14   : > { %p1695_p2 = por %p1694_p1, %p1693_p0 }
  0x15   : > { %p1691_p13 = pneg %p1690_p12 }
  0x16   : > { %p1697_p4 = por %p1696_p3, %p1695_p2 }
  0x18   : > { %p1698_p5 = pnand %p1697_p4, %p1691_p13 }
  0x1a   : > { %1701 = shalt.err (!%p1698_p5)
}
  0x1b   : > { %s1702_s20 = scalar_lea.vmem %s1857_s5, 4096  ;;  %s1769_s21 = smov [#allocation3]  }
  0x1c   : > { %p1703_p6 = scmp.ne.s32.totalorder %s1857_s5, %s1702_s20  ;;  %s1707_s22 = sshll.u32 %s1769_s21, 4  ;;  %s1708_s22 = int_to_ptr.vmem [resolvable:$false] %s1707_s22 }
  0x1d   : > { %s1709_s25 = scalar_lea.vmem %s1708_s22, 8192  ;;  %p1710_p12 = scmp.lt.s32.totalorder %s1857_s5, %s1708_s22 }
  0x1e   : > { %p1705_p8 = pnand %p1703_p6, %p1689_p11  ;;  %p1711_p0 = scmp.lt.s32.totalorder %s1709_s25, %s1702_s20 }
  0x20   : > { %p1706_p10 = pneg %p1705_p8  ;;  %p1712_p1 = por %p1711_p0, %p1710_p12 }
  0x22   : > { %p1713_p2 = pnand %p1712_p1, %p1706_p10 }
  0x24   : > { %1716 = shalt.err (!%p1713_p2)
}
  0x25   : > { %s1770_s26 = smov 64   ;;  %s1771_s27 = smov 4  }
  0x26   : > { %1594 = dma.hbm_to_vmem [thread:$0]  (!%p1853_p9), %s1849_s30, 4096, %s1857_s5, %s1859_s7, %s1770_s26, %s1770_s26, %s1771_s27  }
  0x27   : > { %p1405_p11 = scmp.ge.s32.totalorder %s1767_s17, 1  ;;  %p179_p13 = scmp.lt.s32.totalorder %s1767_s17, 5 }
  0x29   : > { %p180_p3 = pnand %p1405_p11, %p179_p13 }
  0x2a   : > { %s185_s28 = sand.u32 (!%p180_p3), 1, %s1751_s13  }
  0x2b   : > { %183 = sbr.rel (%p180_p3) target bundleno = 371 (0x173), region = 32  ;;  %s1406_s29 = sshll.u32 (!%p180_p3), %s185_s28, 8 }
  0x2c   : > { %s186_s4 = scalar_lea.sflag (!%p180_p3), [#allocation4], %s185_s28  ;;  %s1890_s8 = scalar_lea.vmem (!%p180_p3), [#allocation3], %s1406_s29 }
  0x32   : > { %1742 = dma.done.wait (%p1836_p7), %s186_s4, 4096  }
  0x33   : > { %1744 = vsyncadd (%p1836_p7), %s186_s4, 4294963200  ;;  %vm235_vm0 = vcmask 261120   ;;  %v1772_v0 = vmov 0.0   ;;  %v1647_v1 = vld [vmem:[%s2375_s1] sm:$0xff]   ;;  %v1648_v2 = vld [vmem:[%s2375_s1 + $0x8] sm:$0xff]   ;;  %s1407_s28 = sshll.u32 %s1759_s15, 6 }
  0x34   : > { %238 = vst.msk [vmem:[#allocation2 + $0x10] sm:$0xff] %vm235_vm0, %v1772_v0  ;;  %236 = vst.msk [vmem:[#allocation2] sm:$0xff] %vm235_vm0, %v1772_v0  ;;  %1493 = vmatprep.subr.bf16.mxu0 %v1647_v1  ;;  %1573 = vmatprep.subr.bf16.mxu1 %v1647_v1  ;;  %v1649_v3 = vld [vmem:[%s2375_s1 + $0x10] sm:$0xff]   ;;  %v1650_v4 = vld [vmem:[%s2375_s1 + $0x18] sm:$0xff]   ;;  %p2081_p7 = scmp.lt.s32.totalorder %s1407_s28, 255 }
  0x35   : > { %237 = vst.msk [vmem:[#allocation2 + $0x8] sm:$0xff] %vm235_vm0, %v1772_v0  ;;  %239 = vst.msk [vmem:[#allocation2 + $0x18] sm:$0xff] %vm235_vm0, %v1772_v0  ;;  %1494 = vmatpush3.bf16.msra.mxu0 %v1647_v1  ;;  %1581 = vmatpush3.bf16.msra.mxu1 %v1647_v1  ;;  %v1655_v5 = vld [vmem:[%s1890_s8] sm:$0xff]   ;;  %v1652_v8 = vld [vmem:[%s2375_s1 + $0x28] sm:$0xff]  }
  0x36   : > { %240 = vst.msk [vmem:[#allocation2 + $0x20] sm:$0xff] %vm235_vm0, %v1772_v0  ;;  %241 = vst.msk [vmem:[#allocation2 + $0x28] sm:$0xff] %vm235_vm0, %v1772_v0  ;;  %1495 = vmatprep.subr.bf16.mxu0 %v1648_v2  ;;  %1574 = vmatprep.subr.bf16.mxu1 %v1648_v2  ;;  %v1656_v6 = vld [vmem:[%s1890_s8 + $0x80] sm:$0xff]   ;;  %v1653_v9 = vld [vmem:[%s2375_s1 + $0x30] sm:$0xff]   ;;  %s2390_s28 = smov (!%p2081_p7, %s1407_s28), 255 }
  0x37   : > { %242 = vst.msk [vmem:[#allocation2 + $0x30] sm:$0xff] %vm235_vm0, %v1772_v0  ;;  %243 = vst.msk [vmem:[#allocation2 + $0x38] sm:$0xff] %vm235_vm0, %v1772_v0  ;;  %1509 = vmatprep.mubr.bf16.mxu0 %v1655_v5  ;;  %v1651_v7 = vld [vmem:[%s2375_s1 + $0x20] sm:$0xff]   ;;  %1541 = vmatprep.mubr.bf16.mxu1 %v1656_v6  ;;  %v1654_v10 = vld [vmem:[%s2375_s1 + $0x38] sm:$0xff]   ;;  %s1408_s15 = sshll.u32 %s2390_s28, 3 }
  0x38   : > { %244 = vst.msk [vmem:[#allocation2 + $0x40] sm:$0xff] %vm235_vm0, %v1772_v0  ;;  %245 = vst.msk [vmem:[#allocation2 + $0x48] sm:$0xff] %vm235_vm0, %v1772_v0  ;;  %v1657_v11 = vld [vmem:[%s1890_s8 + $0x8] sm:$0xff]   ;;  %v1659_v13 = vld [vmem:[%s1890_s8 + $0x10] sm:$0xff]   ;;  %s2106_s5 = scalar_lea.vmem %s2377_s3, %s1408_s15 }
  0x39   : > { %246 = vst.msk [vmem:[#allocation2 + $0x50] sm:$0xff] %vm235_vm0, %v1772_v0  ;;  %247 = vst.msk [vmem:[#allocation2 + $0x58] sm:$0xff] %vm235_vm0, %v1772_v0  ;;  %1496 = vmatpush3.bf16.msra.mxu0 %v1648_v2  ;;  %1582 = vmatpush3.bf16.msra.mxu1 %v1648_v2  ;;  %v1658_v12 = vld [vmem:[%s1890_s8 + $0x88] sm:$0xff]   ;;  %v1660_v14 = vld [vmem:[%s1890_s8 + $0x90] sm:$0xff]  }
  0x3a   : > { %248 = vst.msk [vmem:[#allocation2 + $0x60] sm:$0xff] %vm235_vm0, %v1772_v0  ;;  %249 = vst.msk [vmem:[#allocation2 + $0x68] sm:$0xff] %vm235_vm0, %v1772_v0  ;;  %1497 = vmatprep.subr.bf16.mxu0 %v1649_v3  ;;  %1575 = vmatprep.subr.bf16.mxu1 %v1649_v3  ;;  %v1661_v15 = vld [vmem:[%s1890_s8 + $0x18] sm:$0xff]   ;;  %v1663_v17 = vld [vmem:[%s1890_s8 + $0x20] sm:$0xff]  }
  0x3b   : > { %250 = vst.msk [vmem:[#allocation2 + $0x70] sm:$0xff] %vm235_vm0, %v1772_v0  ;;  %251 = vst.msk [vmem:[#allocation2 + $0x78] sm:$0xff] %vm235_vm0, %v1772_v0  ;;  %v1662_v16 = vld [vmem:[%s1890_s8 + $0x98] sm:$0xff]   ;;  %v1664_v18 = vld [vmem:[%s1890_s8 + $0xa0] sm:$0xff]  }
  0x3c   : > { %252 = vst.msk [vmem:[#allocation2 + $0x80] sm:$0xff] %vm235_vm0, %v1772_v0  ;;  %253 = vst.msk [vmem:[#allocation2 + $0x88] sm:$0xff] %vm235_vm0, %v1772_v0  ;;  %v1665_v19 = vld [vmem:[%s1890_s8 + $0x28] sm:$0xff]   ;;  %v1667_v21 = vld [vmem:[%s1890_s8 + $0x30] sm:$0xff]  }
  0x3d   : > { %254 = vst.msk [vmem:[#allocation2 + $0x90] sm:$0xff] %vm235_vm0, %v1772_v0  ;;  %255 = vst.msk [vmem:[#allocation2 + $0x98] sm:$0xff] %vm235_vm0, %v1772_v0  ;;  %1498 = vmatpush3.bf16.msra.mxu0 %v1649_v3  ;;  %1583 = vmatpush3.bf16.msra.mxu1 %v1649_v3  ;;  %v1666_v20 = vld [vmem:[%s1890_s8 + $0xa8] sm:$0xff]   ;;  %v1668_v22 = vld [vmem:[%s1890_s8 + $0xb0] sm:$0xff]  }
  0x3e   : > { %256 = vst.msk [vmem:[#allocation2 + $0xa0] sm:$0xff] %vm235_vm0, %v1772_v0  ;;  %257 = vst.msk [vmem:[#allocation2 + $0xa8] sm:$0xff] %vm235_vm0, %v1772_v0  ;;  %1499 = vmatprep.subr.bf16.mxu0 %v1650_v4  ;;  %1576 = vmatprep.subr.bf16.mxu1 %v1650_v4  ;;  %v1669_v23 = vld [vmem:[%s1890_s8 + $0x38] sm:$0xff]   ;;  %v1671_v25 = vld [vmem:[%s1890_s8 + $0x40] sm:$0xff]  }
  0x3f   : > { %258 = vst.msk [vmem:[#allocation2 + $0xb0] sm:$0xff] %vm235_vm0, %v1772_v0  ;;  %259 = vst.msk [vmem:[#allocation2 + $0xb8] sm:$0xff] %vm235_vm0, %v1772_v0  ;;  %v1670_v24 = vld [vmem:[%s1890_s8 + $0xb8] sm:$0xff]   ;;  %v1672_v26 = vld [vmem:[%s1890_s8 + $0xc0] sm:$0xff]  }
  0x40   : > { %260 = vst.msk [vmem:[#allocation2 + $0xc0] sm:$0xff] %vm235_vm0, %v1772_v0  ;;  %261 = vst.msk [vmem:[#allocation2 + $0xc8] sm:$0xff] %vm235_vm0, %v1772_v0  ;;  %v1673_v27 = vld [vmem:[%s1890_s8 + $0x48] sm:$0xff]   ;;  %v1675_v29 = vld [vmem:[%s1890_s8 + $0x50] sm:$0xff]  }
  0x41   : > { %262 = vst.msk [vmem:[#allocation2 + $0xd0] sm:$0xff] %vm235_vm0, %v1772_v0  ;;  %263 = vst.msk [vmem:[#allocation2 + $0xd8] sm:$0xff] %vm235_vm0, %v1772_v0  ;;  %1500 = vmatpush3.bf16.msra.mxu0 %v1650_v4  ;;  %1584 = vmatpush3.bf16.msra.mxu1 %v1650_v4  ;;  %v1674_v28 = vld [vmem:[%s1890_s8 + $0xc8] sm:$0xff]   ;;  %v1676_v30 = vld [vmem:[%s1890_s8 + $0xd0] sm:$0xff]  }
  0x42   : > { %264 = vst.msk [vmem:[#allocation2 + $0xe0] sm:$0xff] %vm235_vm0, %v1772_v0  ;;  %265 = vst.msk [vmem:[#allocation2 + $0xe8] sm:$0xff] %vm235_vm0, %v1772_v0  ;;  %1501 = vmatprep.subr.bf16.mxu0 %v1651_v7  ;;  %1577 = vmatprep.subr.bf16.mxu1 %v1651_v7  ;;  %v1677_v31 = vld [vmem:[%s1890_s8 + $0x58] sm:$0xff]   ;;  %v1679_v33 = vld [vmem:[%s1890_s8 + $0x60] sm:$0xff]  }
  0x43   : > { %266 = vst.msk [vmem:[#allocation2 + $0xf0] sm:$0xff] %vm235_vm0, %v1772_v0  ;;  %267 = vst.msk [vmem:[#allocation2 + $0xf8] sm:$0xff] %vm235_vm0, %v1772_v0  ;;  %v1678_v32 = vld [vmem:[%s1890_s8 + $0xd8] sm:$0xff]   ;;  %v1680_v34 = vld [vmem:[%s1890_s8 + $0xe0] sm:$0xff]  }
  0x44   : > { %268 = vst.msk [vmem:[#allocation2 + $0x100] sm:$0xff] %vm235_vm0, %v1772_v0  ;;  %269 = vst.msk [vmem:[#allocation2 + $0x108] sm:$0xff] %vm235_vm0, %v1772_v0  ;;  %v1681_v35 = vld [vmem:[%s1890_s8 + $0x68] sm:$0xff]   ;;  %v1683_v37 = vld [vmem:[%s1890_s8 + $0x70] sm:$0xff]  }
  0x45   : > { %270 = vst.msk [vmem:[#allocation2 + $0x110] sm:$0xff] %vm235_vm0, %v1772_v0  ;;  %271 = vst.msk [vmem:[#allocation2 + $0x118] sm:$0xff] %vm235_vm0, %v1772_v0  ;;  %1502 = vmatpush3.bf16.msra.mxu0 %v1651_v7  ;;  %1585 = vmatpush3.bf16.msra.mxu1 %v1651_v7  ;;  %v1682_v36 = vld [vmem:[%s1890_s8 + $0xe8] sm:$0xff]   ;;  %v1684_v38 = vld [vmem:[%s1890_s8 + $0xf0] sm:$0xff]  }
  0x46   : > { %272 = vst.msk [vmem:[#allocation2 + $0x120] sm:$0xff] %vm235_vm0, %v1772_v0  ;;  %273 = vst.msk [vmem:[#allocation2 + $0x128] sm:$0xff] %vm235_vm0, %v1772_v0  ;;  %1503 = vmatprep.subr.bf16.mxu0 %v1652_v8  ;;  %1578 = vmatprep.subr.bf16.mxu1 %v1652_v8  ;;  %v1685_v39 = vld [vmem:[%s1890_s8 + $0x78] sm:$0xff]   ;;  %v302_v41 = vld [vmem:[#allocation2 + $0x10] sm:$0xff] }
  0x47   : > { %274 = vst.msk [vmem:[#allocation2 + $0x130] sm:$0xff] %vm235_vm0, %v1772_v0  ;;  %275 = vst.msk [vmem:[#allocation2 + $0x138] sm:$0xff] %vm235_vm0, %v1772_v0  ;;  %v1686_v40 = vld [vmem:[%s1890_s8 + $0xf8] sm:$0xff]   ;;  %v300_v43 = vld [vmem:[#allocation2] sm:$0xff] }
  0x48   : > { %276 = vst.msk [vmem:[#allocation2 + $0x140] sm:$0xff] %vm235_vm0, %v1772_v0  ;;  %277 = vst.msk [vmem:[#allocation2 + $0x148] sm:$0xff] %vm235_vm0, %v1772_v0  ;;  %v303_v47 = vld [vmem:[#allocation2 + $0x18] sm:$0xff]  ;;  %v301_v53 = vld [vmem:[#allocation2 + $0x8] sm:$0xff] }
  0x49   : > { %278 = vst.msk [vmem:[#allocation2 + $0x150] sm:$0xff] %vm235_vm0, %v1772_v0  ;;  %279 = vst.msk [vmem:[#allocation2 + $0x158] sm:$0xff] %vm235_vm0, %v1772_v0  ;;  %1504 = vmatpush3.bf16.msra.mxu0 %v1652_v8  ;;  %1586 = vmatpush3.bf16.msra.mxu1 %v1652_v8  ;;  %v306_v1 = vld [vmem:[#allocation2 + $0x30] sm:$0xff]  ;;  %v304_v3 = vld [vmem:[#allocation2 + $0x20] sm:$0xff] }
  0x4a   : > { %280 = vst.msk [vmem:[#allocation2 + $0x160] sm:$0xff] %vm235_vm0, %v1772_v0  ;;  %281 = vst.msk [vmem:[#allocation2 + $0x168] sm:$0xff] %vm235_vm0, %v1772_v0  ;;  %1505 = vmatprep.subr.bf16.mxu0 %v1653_v9  ;;  %1579 = vmatprep.subr.bf16.mxu1 %v1653_v9  ;;  %v2101_v5 = vld [vmem:[%s2376_s2] ss:$0 sm:$0xff]  ;;  %v307_v8 = vld [vmem:[#allocation2 + $0x38] sm:$0xff] }
  0x4b   : > { %282 = vst.msk [vmem:[#allocation2 + $0x170] sm:$0xff] %vm235_vm0, %v1772_v0  ;;  %283 = vst.msk [vmem:[#allocation2 + $0x178] sm:$0xff] %vm235_vm0, %v1772_v0  ;;  %v332_v44 = vld [vmem:[#allocation2 + $0x100] sm:$0xff]  ;;  %v333_v54 = vld [vmem:[#allocation2 + $0x108] sm:$0xff] }
  0x4c   : > { %284 = vst.msk [vmem:[#allocation2 + $0x180] sm:$0xff] %vm235_vm0, %v1772_v0  ;;  %285 = vst.msk [vmem:[#allocation2 + $0x188] sm:$0xff] %vm235_vm0, %v1772_v0  ;;  %v334_v42 = vld [vmem:[#allocation2 + $0x110] sm:$0xff]  ;;  %v335_v48 = vld [vmem:[#allocation2 + $0x118] sm:$0xff] }
  0x4d   : > { %286 = vst.msk [vmem:[#allocation2 + $0x190] sm:$0xff] %vm235_vm0, %v1772_v0  ;;  %287 = vst.msk [vmem:[#allocation2 + $0x198] sm:$0xff] %vm235_vm0, %v1772_v0  ;;  %1506 = vmatpush3.bf16.msra.mxu0 %v1653_v9  ;;  %1587 = vmatpush3.bf16.msra.mxu1 %v1653_v9  ;;  %v336_v4 = vld [vmem:[#allocation2 + $0x120] sm:$0xff] }
  0x4e   : > { %288 = vst.msk [vmem:[#allocation2 + $0x1a0] sm:$0xff] %vm235_vm0, %v1772_v0  ;;  %289 = vst.msk [vmem:[#allocation2 + $0x1a8] sm:$0xff] %vm235_vm0, %v1772_v0  ;;  %1507 = vmatprep.subr.bf16.mxu0 %v1654_v10  ;;  %1580 = vmatprep.subr.bf16.mxu1 %v1654_v10  ;;  %v338_v2 = vld [vmem:[#allocation2 + $0x130] sm:$0xff]  ;;  %v339_v9 = vld [vmem:[#allocation2 + $0x138] sm:$0xff] }
  0x4f   : > { %290 = vst.msk [vmem:[#allocation2 + $0x1b0] sm:$0xff] %vm235_vm0, %v1772_v0  ;;  %291 = vst.msk [vmem:[#allocation2 + $0x1b8] sm:$0xff] %vm235_vm0, %v1772_v0 }
  0x50   : > { %292 = vst.msk [vmem:[#allocation2 + $0x1c0] sm:$0xff] %vm235_vm0, %v1772_v0  ;;  %293 = vst.msk [vmem:[#allocation2 + $0x1c8] sm:$0xff] %vm235_vm0, %v1772_v0 }
  0x51   : > { %294 = vst.msk [vmem:[#allocation2 + $0x1d0] sm:$0xff] %vm235_vm0, %v1772_v0  ;;  %295 = vst.msk [vmem:[#allocation2 + $0x1d8] sm:$0xff] %vm235_vm0, %v1772_v0  ;;  %1508 = vmatpush3.bf16.msra.mxu0 %v1654_v10  ;;  %1588 = vmatpush3.bf16.msra.mxu1 %v1654_v10 }
  0x52   : > { %296 = vst.msk [vmem:[#allocation2 + $0x1e0] sm:$0xff] %vm235_vm0, %v1772_v0  ;;  %297 = vst.msk [vmem:[#allocation2 + $0x1e8] sm:$0xff] %vm235_vm0, %v1772_v0 }
  0x53   : > { %298 = vst.msk [vmem:[#allocation2 + $0x1f0] sm:$0xff] %vm235_vm0, %v1772_v0  ;;  %299 = vst.msk [vmem:[#allocation2 + $0x1f8] sm:$0xff] %vm235_vm0, %v1772_v0 }
  0x54   : > { %1510 = vmatmul.mubr.bf16.vlgmr.msra.gmra.mrb[0].mxu0 %v1657_v11  ;;  %1542 = vmatmul.mubr.bf16.vlgmr.msra.gmra.mrb[0].mxu1 %v1658_v12 }
  0x55   : > { %1513 = vmatprep.mubr.bf16.mxu0 %v1659_v13  ;;  %1545 = vmatprep.mubr.bf16.mxu1 %v1660_v14  ;;  %v305_v14 = vld [vmem:[#allocation2 + $0x28] sm:$0xff] }
  0x5c   : > { %1514 = vmatmul.mubr.bf16.gmra.mrb[4].mxu0 %v1661_v15  ;;  %1546 = vmatmul.mubr.bf16.gmra.mrb[4].mxu1 %v1662_v16  ;;  %v337_v15 = vld [vmem:[#allocation2 + $0x128] sm:$0xff] }
  0x5d   : > { %1517 = vmatprep.mubr.bf16.mxu0 %v1663_v17  ;;  %1549 = vmatprep.mubr.bf16.mxu1 %v1664_v18 }
  0x64   : > { %1518 = vmatmul.mubr.bf16.gmra.mrb[8].mxu0 %v1665_v19  ;;  %1550 = vmatmul.mubr.bf16.gmra.mrb[8].mxu1 %v1666_v20 }
  0x65   : > { %1521 = vmatprep.mubr.bf16.mxu0 %v1667_v21  ;;  %1553 = vmatprep.mubr.bf16.mxu1 %v1668_v22 }
  0x6c   : > { %1522 = vmatmul.mubr.bf16.gmra.mrb[12].mxu0 %v1669_v23  ;;  %1554 = vmatmul.mubr.bf16.gmra.mrb[12].mxu1 %v1670_v24 }
  0x6d   : > { %1525 = vmatprep.mubr.bf16.mxu0 %v1671_v25  ;;  %1557 = vmatprep.mubr.bf16.mxu1 %v1672_v26 }
  0x74   : > { %1526 = vmatmul.mubr.bf16.gmra.mrb[16].mxu0 %v1673_v27  ;;  %1558 = vmatmul.mubr.bf16.gmra.mrb[16].mxu1 %v1674_v28 }
  0x75   : > { %1529 = vmatprep.mubr.bf16.mxu0 %v1675_v29  ;;  %1561 = vmatprep.mubr.bf16.mxu1 %v1676_v30 }
  0x7c   : > { %1530 = vmatmul.mubr.bf16.gmra.mrb[20].mxu0 %v1677_v31  ;;  %1562 = vmatmul.mubr.bf16.gmra.mrb[20].mxu1 %v1678_v32 }
  0x7d   : > { %1533 = vmatprep.mubr.bf16.mxu0 %v1679_v33  ;;  %1565 = vmatprep.mubr.bf16.mxu1 %v1680_v34 }
  0x84   : > { %1534 = vmatmul.mubr.bf16.gmra.mrb[24].mxu0 %v1681_v35  ;;  %1566 = vmatmul.mubr.bf16.gmra.mrb[24].mxu1 %v1682_v36 }
  0x85   : > { %1537 = vmatprep.mubr.bf16.mxu0 %v1683_v37  ;;  %1569 = vmatprep.mubr.bf16.mxu1 %v1684_v38 }
  0x8c   : > { %1538 = vmatmul.mubr.bf16.gmra.mrb[28].mxu0 %v1685_v39  ;;  %1570 = vmatmul.mubr.bf16.gmra.mrb[28].mxu1 %v1686_v40 }
 0x127   : > { %v1511_v45 = vpop.f32.mrb[0].mxu0  ;;  %v1543_v46 = vpop.f32.mrb[0].mxu1 }
 0x128   : > { %v975_v49 = vadd.f32 %v1511_v45, %v302_v41  ;;  %v1007_v50 = vadd.f32 %v1543_v46, %v334_v42  ;;  %v718_v51 = vpop.f32.mrb[1].mxu0  ;;  %v846_v52 = vpop.f32.mrb[1].mxu1  ;;  %v310_v42 = vld [vmem:[#allocation2 + $0x50] sm:$0xff]  ;;  %v340_v45 = vld [vmem:[#allocation2 + $0x140] sm:$0xff] }
 0x129   : > { %v973_v55 = vadd.f32 %v718_v51, %v300_v43  ;;  %v1005_v56 = vadd.f32 %v846_v52, %v332_v44  ;;  %v1512_v57 = vpop.f32.mrb[2].mxu0  ;;  %v1544_v58 = vpop.f32.mrb[2].mxu1  ;;  %v342_v43 = vld [vmem:[#allocation2 + $0x150] sm:$0xff]  ;;  %v308_v44 = vld [vmem:[#allocation2 + $0x40] sm:$0xff] }
 0x12a   : > { %1040 = vst.msk [vmem:[#allocation2 + $0x10] sm:$0xff] %vm235_vm0, %v975_v49  ;;  %1072 = vst.msk [vmem:[#allocation2 + $0x110] sm:$0xff] %vm235_vm0, %v1007_v50  ;;  %v976_v59 = vadd.f32 %v1512_v57, %v303_v47  ;;  %v1008_v60 = vadd.f32 %v1544_v58, %v335_v48  ;;  %v721_v61 = vpop.f32.mrb[3].mxu0  ;;  %v849_v62 = vpop.f32.mrb[3].mxu1  ;;  %v311_v48 = vld [vmem:[#allocation2 + $0x58] sm:$0xff] }
 0x12b   : > { %1038 = vst.msk [vmem:[#allocation2] sm:$0xff] %vm235_vm0, %v973_v55  ;;  %1070 = vst.msk [vmem:[#allocation2 + $0x100] sm:$0xff] %vm235_vm0, %v1005_v56  ;;  %v974_v63 = vadd.f32 %v721_v61, %v301_v53  ;;  %v1006_v0 = vadd.f32 %v849_v62, %v333_v54  ;;  %v343_v49 = vld [vmem:[#allocation2 + $0x158] sm:$0xff]  ;;  %v309_v54 = vld [vmem:[#allocation2 + $0x48] sm:$0xff] }
 0x12c   : > { %1041 = vst.msk [vmem:[#allocation2 + $0x18] sm:$0xff] %vm235_vm0, %v976_v59  ;;  %1073 = vst.msk [vmem:[#allocation2 + $0x118] sm:$0xff] %vm235_vm0, %v1008_v60  ;;  %v341_v55 = vld [vmem:[#allocation2 + $0x148] sm:$0xff] }
 0x12d   : > { %1039 = vst.msk [vmem:[#allocation2 + $0x8] sm:$0xff] %vm235_vm0, %v974_v63  ;;  %1071 = vst.msk [vmem:[#allocation2 + $0x108] sm:$0xff] %vm235_vm0, %v1006_v0 }
 0x12f   : > { %v1515_v6 = vpop.f32.mrb[4].mxu0  ;;  %v1547_v7 = vpop.f32.mrb[4].mxu1 }
 0x130   : > { %v979_v10 = vadd.f32 %v1515_v6, %v306_v1  ;;  %v1011_v11 = vadd.f32 %v1547_v7, %v338_v2  ;;  %v734_v12 = vpop.f32.mrb[5].mxu0  ;;  %v862_v13 = vpop.f32.mrb[5].mxu1 }
 0x131   : > { %v1107_v16 = vld [vmem:[#allocation2 + $0x10] sm:$0xff]  ;;  %v977_v18 = vadd.f32 %v734_v12, %v304_v3  ;;  %v1009_v19 = vadd.f32 %v862_v13, %v336_v4  ;;  %v1516_v20 = vpop.f32.mrb[6].mxu0  ;;  %v1548_v21 = vpop.f32.mrb[6].mxu1 }
 0x132   : > { %v1139_v17 = vld [vmem:[#allocation2 + $0x110] sm:$0xff]  ;;  %v1178_v22 = vadd.f32 %v2101_v5, %v1107_v16  ;;  %v1105_v24 = vld [vmem:[#allocation2] sm:$0xff]  ;;  %1044 = vst.msk [vmem:[#allocation2 + $0x30] sm:$0xff] %vm235_vm0, %v979_v10  ;;  %1076 = vst.msk [vmem:[#allocation2 + $0x130] sm:$0xff] %vm235_vm0, %v1011_v11  ;;  %v980_v26 = vadd.f32 %v1516_v20, %v307_v8  ;;  %v1012_v27 = vadd.f32 %v1548_v21, %v339_v9  ;;  %v737_v28 = vpop.f32.mrb[7].mxu0  ;;  %v865_v29 = vpop.f32.mrb[7].mxu1 }
 0x133   : > { %v1210_v23 = vadd.f32 %v2101_v5, %v1139_v17  ;;  %v1137_v25 = vld [vmem:[#allocation2 + $0x100] sm:$0xff]  ;;  %v1176_v30 = vadd.f32 %v2101_v5, %v1105_v24  ;;  %v1108_v32 = vld [vmem:[#allocation2 + $0x18] sm:$0xff]  ;;  %1042 = vst.msk [vmem:[#allocation2 + $0x20] sm:$0xff] %vm235_vm0, %v977_v18  ;;  %1074 = vst.msk [vmem:[#allocation2 + $0x120] sm:$0xff] %vm235_vm0, %v1009_v19  ;;  %v978_v34 = vadd.f32 %v737_v28, %v305_v14 }
 0x134   : > { %v1208_v31 = vadd.f32 %v2101_v5, %v1137_v25  ;;  %v1140_v33 = vld [vmem:[#allocation2 + $0x118] sm:$0xff]  ;;  %v1010_v35 = vadd.f32 %v865_v29, %v337_v15  ;;  %1242 = vst.msk [vmem:[%s2106_s5 + $0x10] sm:$0xff] %vm235_vm0, %v1178_v22  ;;  %v1179_v36 = vadd.f32 %v2101_v5, %v1108_v32  ;;  %v1106_v38 = vld [vmem:[#allocation2 + $0x8] sm:$0xff]  ;;  %1045 = vst.msk [vmem:[#allocation2 + $0x38] sm:$0xff] %vm235_vm0, %v980_v26 }
 0x135   : > { %1274 = vst.msk [vmem:[%s2106_s5 + $0x110] sm:$0xff] %vm235_vm0, %v1210_v23  ;;  %v1211_v37 = vadd.f32 %v2101_v5, %v1140_v33  ;;  %v1138_v39 = vld [vmem:[#allocation2 + $0x108] sm:$0xff]  ;;  %1077 = vst.msk [vmem:[#allocation2 + $0x138] sm:$0xff] %vm235_vm0, %v1012_v27  ;;  %v1177_v40 = vadd.f32 %v2101_v5, %v1106_v38  ;;  %v314_v19 = vld [vmem:[#allocation2 + $0x70] sm:$0xff] }
 0x136   : > { %1240 = vst.msk [vmem:[%s2106_s5] sm:$0xff] %vm235_vm0, %v1176_v30  ;;  %1272 = vst.msk [vmem:[%s2106_s5 + $0x100] sm:$0xff] %vm235_vm0, %v1208_v31  ;;  %v1209_v41 = vadd.f32 %v2101_v5, %v1138_v39  ;;  %v346_v20 = vld [vmem:[#allocation2 + $0x170] sm:$0xff]  ;;  %v312_v21 = vld [vmem:[#allocation2 + $0x60] sm:$0xff] }
 0x137   : > { %1043 = vst.msk [vmem:[#allocation2 + $0x28] sm:$0xff] %vm235_vm0, %v978_v34  ;;  %1075 = vst.msk [vmem:[#allocation2 + $0x128] sm:$0xff] %vm235_vm0, %v1010_v35  ;;  %v1519_v46 = vpop.f32.mrb[8].mxu0  ;;  %v1551_v47 = vpop.f32.mrb[8].mxu1  ;;  %v344_v22 = vld [vmem:[#allocation2 + $0x160] sm:$0xff]  ;;  %v315_v25 = vld [vmem:[#allocation2 + $0x78] sm:$0xff] }
 0x138   : > { %1243 = vst.msk [vmem:[%s2106_s5 + $0x18] sm:$0xff] %vm235_vm0, %v1179_v36  ;;  %1275 = vst.msk [vmem:[%s2106_s5 + $0x118] sm:$0xff] %vm235_vm0, %v1211_v37  ;;  %v983_v50 = vadd.f32 %v1519_v46, %v310_v42  ;;  %v1015_v51 = vadd.f32 %v1551_v47, %v342_v43  ;;  %v750_v52 = vpop.f32.mrb[9].mxu0  ;;  %v878_v53 = vpop.f32.mrb[9].mxu1  ;;  %v347_v26 = vld [vmem:[#allocation2 + $0x178] sm:$0xff]  ;;  %v313_v31 = vld [vmem:[#allocation2 + $0x68] sm:$0xff] }
 0x139   : > { %1241 = vst.msk [vmem:[%s2106_s5 + $0x8] sm:$0xff] %vm235_vm0, %v1177_v40  ;;  %1273 = vst.msk [vmem:[%s2106_s5 + $0x108] sm:$0xff] %vm235_vm0, %v1209_v41  ;;  %v1111_v56 = vld [vmem:[#allocation2 + $0x30] sm:$0xff]  ;;  %v981_v58 = vadd.f32 %v750_v52, %v308_v44  ;;  %v1013_v59 = vadd.f32 %v878_v53, %v340_v45  ;;  %v1520_v60 = vpop.f32.mrb[10].mxu0  ;;  %v1552_v61 = vpop.f32.mrb[10].mxu1  ;;  %v345_v32 = vld [vmem:[#allocation2 + $0x168] sm:$0xff] }
 0x13a   : > { %v1143_v57 = vld [vmem:[#allocation2 + $0x130] sm:$0xff]  ;;  %v1182_v62 = vadd.f32 %v2101_v5, %v1111_v56  ;;  %v1109_v0 = vld [vmem:[#allocation2 + $0x20] sm:$0xff]  ;;  %1048 = vst.msk [vmem:[#allocation2 + $0x50] sm:$0xff] %vm235_vm0, %v983_v50  ;;  %1080 = vst.msk [vmem:[#allocation2 + $0x150] sm:$0xff] %vm235_vm0, %v1015_v51  ;;  %v984_v2 = vadd.f32 %v1520_v60, %v311_v48  ;;  %v1016_v3 = vadd.f32 %v1552_v61, %v343_v49  ;;  %v753_v4 = vpop.f32.mrb[11].mxu0  ;;  %v881_v6 = vpop.f32.mrb[11].mxu1 }
 0x13b   : > { %v1214_v63 = vadd.f32 %v2101_v5, %v1143_v57  ;;  %v1141_v1 = vld [vmem:[#allocation2 + $0x120] sm:$0xff]  ;;  %v1180_v7 = vadd.f32 %v2101_v5, %v1109_v0  ;;  %v1112_v9 = vld [vmem:[#allocation2 + $0x38] sm:$0xff]  ;;  %1046 = vst.msk [vmem:[#allocation2 + $0x40] sm:$0xff] %vm235_vm0, %v981_v58  ;;  %1078 = vst.msk [vmem:[#allocation2 + $0x140] sm:$0xff] %vm235_vm0, %v1013_v59  ;;  %v982_v11 = vadd.f32 %v753_v4, %v309_v54 }
 0x13c   : > { %v1212_v8 = vadd.f32 %v2101_v5, %v1141_v1  ;;  %v1144_v10 = vld [vmem:[#allocation2 + $0x138] sm:$0xff]  ;;  %v1014_v12 = vadd.f32 %v881_v6, %v341_v55  ;;  %1246 = vst.msk [vmem:[%s2106_s5 + $0x30] sm:$0xff] %vm235_vm0, %v1182_v62  ;;  %v1183_v13 = vadd.f32 %v2101_v5, %v1112_v9  ;;  %1049 = vst.msk [vmem:[#allocation2 + $0x58] sm:$0xff] %vm235_vm0, %v984_v2  ;;  %v318_v59 = vld [vmem:[#allocation2 + $0x90] sm:$0xff] }
 0x13d   : > { %1278 = vst.msk [vmem:[%s2106_s5 + $0x130] sm:$0xff] %vm235_vm0, %v1214_v63  ;;  %v1215_v14 = vadd.f32 %v2101_v5, %v1144_v10  ;;  %1081 = vst.msk [vmem:[#allocation2 + $0x158] sm:$0xff] %vm235_vm0, %v1016_v3  ;;  %v350_v60 = vld [vmem:[#allocation2 + $0x190] sm:$0xff]  ;;  %v316_v61 = vld [vmem:[#allocation2 + $0x80] sm:$0xff] }
 0x13e   : > { %v1110_v15 = vld [vmem:[#allocation2 + $0x28] sm:$0xff]  ;;  %1244 = vst.msk [vmem:[%s2106_s5 + $0x20] sm:$0xff] %vm235_vm0, %v1180_v7  ;;  %1276 = vst.msk [vmem:[%s2106_s5 + $0x120] sm:$0xff] %vm235_vm0, %v1212_v8  ;;  %v348_v62 = vld [vmem:[#allocation2 + $0x180] sm:$0xff] }
 0x13f   : > { %v1142_v16 = vld [vmem:[#allocation2 + $0x128] sm:$0xff]  ;;  %v1181_v17 = vadd.f32 %v2101_v5, %v1110_v15  ;;  %1047 = vst.msk [vmem:[#allocation2 + $0x48] sm:$0xff] %vm235_vm0, %v982_v11  ;;  %1079 = vst.msk [vmem:[#allocation2 + $0x148] sm:$0xff] %vm235_vm0, %v1014_v12  ;;  %v1523_v23 = vpop.f32.mrb[12].mxu0  ;;  %v1555_v24 = vpop.f32.mrb[12].mxu1  ;;  %v319_v1 = vld [vmem:[#allocation2 + $0x98] sm:$0xff] }
 0x140   : > { %v1213_v18 = vadd.f32 %v2101_v5, %v1142_v16  ;;  %1247 = vst.msk [vmem:[%s2106_s5 + $0x38] sm:$0xff] %vm235_vm0, %v1183_v13  ;;  %1279 = vst.msk [vmem:[%s2106_s5 + $0x138] sm:$0xff] %vm235_vm0, %v1215_v14  ;;  %v987_v27 = vadd.f32 %v1523_v23, %v314_v19  ;;  %v1019_v28 = vadd.f32 %v1555_v24, %v346_v20  ;;  %v766_v29 = vpop.f32.mrb[13].mxu0  ;;  %v894_v30 = vpop.f32.mrb[13].mxu1  ;;  %v351_v2 = vld [vmem:[#allocation2 + $0x198] sm:$0xff]  ;;  %v317_v8 = vld [vmem:[#allocation2 + $0x88] sm:$0xff] }
 0x141   : > { %1245 = vst.msk [vmem:[%s2106_s5 + $0x28] sm:$0xff] %vm235_vm0, %v1181_v17  ;;  %v1115_v33 = vld [vmem:[#allocation2 + $0x50] sm:$0xff]  ;;  %v985_v35 = vadd.f32 %v766_v29, %v312_v21  ;;  %v1017_v36 = vadd.f32 %v894_v30, %v344_v22  ;;  %v1524_v37 = vpop.f32.mrb[14].mxu0  ;;  %v1556_v38 = vpop.f32.mrb[14].mxu1  ;;  %v349_v9 = vld [vmem:[#allocation2 + $0x188] sm:$0xff] }
 0x142   : > { %1277 = vst.msk [vmem:[%s2106_s5 + $0x128] sm:$0xff] %vm235_vm0, %v1213_v18  ;;  %v1147_v34 = vld [vmem:[#allocation2 + $0x150] sm:$0xff]  ;;  %v1186_v39 = vadd.f32 %v2101_v5, %v1115_v33  ;;  %v1113_v41 = vld [vmem:[#allocation2 + $0x40] sm:$0xff]  ;;  %1052 = vst.msk [vmem:[#allocation2 + $0x70] sm:$0xff] %vm235_vm0, %v987_v27  ;;  %v988_v43 = vadd.f32 %v1524_v37, %v315_v25  ;;  %v1020_v44 = vadd.f32 %v1556_v38, %v347_v26  ;;  %v769_v45 = vpop.f32.mrb[15].mxu0  ;;  %v897_v46 = vpop.f32.mrb[15].mxu1 }
 0x143   : > { %v1218_v40 = vadd.f32 %v2101_v5, %v1147_v34  ;;  %v1145_v42 = vld [vmem:[#allocation2 + $0x140] sm:$0xff]  ;;  %1084 = vst.msk [vmem:[#allocation2 + $0x170] sm:$0xff] %vm235_vm0, %v1019_v28  ;;  %v1184_v47 = vadd.f32 %v2101_v5, %v1113_v41  ;;  %v1116_v49 = vld [vmem:[#allocation2 + $0x58] sm:$0xff]  ;;  %1050 = vst.msk [vmem:[#allocation2 + $0x60] sm:$0xff] %vm235_vm0, %v985_v35  ;;  %v986_v51 = vadd.f32 %v769_v45, %v313_v31 }
 0x144   : > { %v1216_v48 = vadd.f32 %v2101_v5, %v1145_v42  ;;  %v1148_v50 = vld [vmem:[#allocation2 + $0x158] sm:$0xff]  ;;  %1082 = vst.msk [vmem:[#allocation2 + $0x160] sm:$0xff] %vm235_vm0, %v1017_v36  ;;  %v1018_v52 = vadd.f32 %v897_v46, %v345_v32  ;;  %1250 = vst.msk [vmem:[%s2106_s5 + $0x50] sm:$0xff] %vm235_vm0, %v1186_v39  ;;  %v1187_v53 = vadd.f32 %v2101_v5, %v1116_v49  ;;  %v322_v36 = vld [vmem:[#allocation2 + $0xb0] sm:$0xff] }
 0x145   : > { %1282 = vst.msk [vmem:[%s2106_s5 + $0x150] sm:$0xff] %vm235_vm0, %v1218_v40  ;;  %v1219_v54 = vadd.f32 %v2101_v5, %v1148_v50  ;;  %1053 = vst.msk [vmem:[#allocation2 + $0x78] sm:$0xff] %vm235_vm0, %v988_v43  ;;  %v354_v37 = vld [vmem:[#allocation2 + $0x1b0] sm:$0xff]  ;;  %v320_v38 = vld [vmem:[#allocation2 + $0xa0] sm:$0xff] }
 0x146   : > { %v1114_v55 = vld [vmem:[#allocation2 + $0x48] sm:$0xff]  ;;  %1085 = vst.msk [vmem:[#allocation2 + $0x178] sm:$0xff] %vm235_vm0, %v1020_v44  ;;  %1248 = vst.msk [vmem:[%s2106_s5 + $0x40] sm:$0xff] %vm235_vm0, %v1184_v47  ;;  %v352_v39 = vld [vmem:[#allocation2 + $0x1a0] sm:$0xff] }
 0x147   : > { %v1146_v56 = vld [vmem:[#allocation2 + $0x148] sm:$0xff]  ;;  %1280 = vst.msk [vmem:[%s2106_s5 + $0x140] sm:$0xff] %vm235_vm0, %v1216_v48  ;;  %v1185_v57 = vadd.f32 %v2101_v5, %v1114_v55  ;;  %1051 = vst.msk [vmem:[#allocation2 + $0x68] sm:$0xff] %vm235_vm0, %v986_v51  ;;  %v1527_v63 = vpop.f32.mrb[16].mxu0  ;;  %v1559_v0 = vpop.f32.mrb[16].mxu1  ;;  %v323_v42 = vld [vmem:[#allocation2 + $0xb8] sm:$0xff] }
 0x148   : > { %v1217_v58 = vadd.f32 %v2101_v5, %v1146_v56  ;;  %1083 = vst.msk [vmem:[#allocation2 + $0x168] sm:$0xff] %vm235_vm0, %v1018_v52  ;;  %1251 = vst.msk [vmem:[%s2106_s5 + $0x58] sm:$0xff] %vm235_vm0, %v1187_v53  ;;  %v991_v3 = vadd.f32 %v1527_v63, %v318_v59  ;;  %v1023_v4 = vadd.f32 %v1559_v0, %v350_v60  ;;  %v782_v6 = vpop.f32.mrb[17].mxu0  ;;  %v910_v7 = vpop.f32.mrb[17].mxu1  ;;  %v355_v43 = vld [vmem:[#allocation2 + $0x1b8] sm:$0xff]  ;;  %v321_v48 = vld [vmem:[#allocation2 + $0xa8] sm:$0xff] }
 0x149   : > { %1283 = vst.msk [vmem:[%s2106_s5 + $0x158] sm:$0xff] %vm235_vm0, %v1219_v54  ;;  %1249 = vst.msk [vmem:[%s2106_s5 + $0x48] sm:$0xff] %vm235_vm0, %v1185_v57  ;;  %v1119_v10 = vld [vmem:[#allocation2 + $0x70] sm:$0xff]  ;;  %v989_v12 = vadd.f32 %v782_v6, %v316_v61  ;;  %v1021_v13 = vadd.f32 %v910_v7, %v348_v62  ;;  %v1528_v14 = vpop.f32.mrb[18].mxu0  ;;  %v1560_v15 = vpop.f32.mrb[18].mxu1  ;;  %v353_v49 = vld [vmem:[#allocation2 + $0x1a8] sm:$0xff] }
 0x14a   : > { %1281 = vst.msk [vmem:[%s2106_s5 + $0x148] sm:$0xff] %vm235_vm0, %v1217_v58  ;;  %v1151_v11 = vld [vmem:[#allocation2 + $0x170] sm:$0xff]  ;;  %v1190_v16 = vadd.f32 %v2101_v5, %v1119_v10  ;;  %v1117_v18 = vld [vmem:[#allocation2 + $0x60] sm:$0xff]  ;;  %1056 = vst.msk [vmem:[#allocation2 + $0x90] sm:$0xff] %vm235_vm0, %v991_v3  ;;  %v992_v20 = vadd.f32 %v1528_v14, %v319_v1  ;;  %v1024_v21 = vadd.f32 %v1560_v15, %v351_v2  ;;  %v785_v22 = vpop.f32.mrb[19].mxu0  ;;  %v913_v23 = vpop.f32.mrb[19].mxu1 }
 0x14b   : > { %v1222_v17 = vadd.f32 %v2101_v5, %v1151_v11  ;;  %v1149_v19 = vld [vmem:[#allocation2 + $0x160] sm:$0xff]  ;;  %1088 = vst.msk [vmem:[#allocation2 + $0x190] sm:$0xff] %vm235_vm0, %v1023_v4  ;;  %v1188_v24 = vadd.f32 %v2101_v5, %v1117_v18  ;;  %1054 = vst.msk [vmem:[#allocation2 + $0x80] sm:$0xff] %vm235_vm0, %v989_v12  ;;  %v990_v28 = vadd.f32 %v785_v22, %v317_v8  ;;  %v358_v14 = vld [vmem:[#allocation2 + $0x1d0] sm:$0xff] }
 0x14c   : > { %v1220_v25 = vadd.f32 %v2101_v5, %v1149_v19  ;;  %v1120_v26 = vld [vmem:[#allocation2 + $0x78] sm:$0xff]  ;;  %1086 = vst.msk [vmem:[#allocation2 + $0x180] sm:$0xff] %vm235_vm0, %v1021_v13  ;;  %v1022_v29 = vadd.f32 %v913_v23, %v349_v9  ;;  %1254 = vst.msk [vmem:[%s2106_s5 + $0x70] sm:$0xff] %vm235_vm0, %v1190_v16  ;;  %v326_v13 = vld [vmem:[#allocation2 + $0xd0] sm:$0xff] }
 0x14d   : > { %v1152_v27 = vld [vmem:[#allocation2 + $0x178] sm:$0xff]  ;;  %1286 = vst.msk [vmem:[%s2106_s5 + $0x170] sm:$0xff] %vm235_vm0, %v1222_v17  ;;  %v1191_v30 = vadd.f32 %v2101_v5, %v1120_v26  ;;  %1057 = vst.msk [vmem:[#allocation2 + $0x98] sm:$0xff] %vm235_vm0, %v992_v20  ;;  %v324_v15 = vld [vmem:[#allocation2 + $0xc0] sm:$0xff] }
 0x14e   : > { %v1223_v31 = vadd.f32 %v2101_v5, %v1152_v27  ;;  %v1118_v32 = vld [vmem:[#allocation2 + $0x68] sm:$0xff]  ;;  %1089 = vst.msk [vmem:[#allocation2 + $0x198] sm:$0xff] %vm235_vm0, %v1024_v21  ;;  %1252 = vst.msk [vmem:[%s2106_s5 + $0x60] sm:$0xff] %vm235_vm0, %v1188_v24  ;;  %v356_v16 = vld [vmem:[#allocation2 + $0x1c0] sm:$0xff] }
 0x14f   : > { %v1150_v33 = vld [vmem:[#allocation2 + $0x168] sm:$0xff]  ;;  %1284 = vst.msk [vmem:[%s2106_s5 + $0x160] sm:$0xff] %vm235_vm0, %v1220_v25  ;;  %v1189_v34 = vadd.f32 %v2101_v5, %v1118_v32  ;;  %1055 = vst.msk [vmem:[#allocation2 + $0x88] sm:$0xff] %vm235_vm0, %v990_v28  ;;  %v1531_v40 = vpop.f32.mrb[20].mxu0  ;;  %v1563_v41 = vpop.f32.mrb[20].mxu1  ;;  %v327_v19 = vld [vmem:[#allocation2 + $0xd8] sm:$0xff] }
 0x150   : > { %v1221_v35 = vadd.f32 %v2101_v5, %v1150_v33  ;;  %1087 = vst.msk [vmem:[#allocation2 + $0x188] sm:$0xff] %vm235_vm0, %v1022_v29  ;;  %1255 = vst.msk [vmem:[%s2106_s5 + $0x78] sm:$0xff] %vm235_vm0, %v1191_v30  ;;  %v995_v44 = vadd.f32 %v1531_v40, %v322_v36  ;;  %v1027_v45 = vadd.f32 %v1563_v41, %v354_v37  ;;  %v798_v46 = vpop.f32.mrb[21].mxu0  ;;  %v926_v47 = vpop.f32.mrb[21].mxu1  ;;  %v359_v20 = vld [vmem:[#allocation2 + $0x1d8] sm:$0xff]  ;;  %v325_v25 = vld [vmem:[#allocation2 + $0xc8] sm:$0xff] }
 0x151   : > { %1287 = vst.msk [vmem:[%s2106_s5 + $0x178] sm:$0xff] %vm235_vm0, %v1223_v31  ;;  %1253 = vst.msk [vmem:[%s2106_s5 + $0x68] sm:$0xff] %vm235_vm0, %v1189_v34  ;;  %v1123_v50 = vld [vmem:[#allocation2 + $0x90] sm:$0xff]  ;;  %v993_v52 = vadd.f32 %v798_v46, %v320_v38  ;;  %v1025_v53 = vadd.f32 %v926_v47, %v352_v39  ;;  %v1532_v54 = vpop.f32.mrb[22].mxu0  ;;  %v1564_v55 = vpop.f32.mrb[22].mxu1  ;;  %v357_v26 = vld [vmem:[#allocation2 + $0x1c8] sm:$0xff] }
 0x152   : > { %1285 = vst.msk [vmem:[%s2106_s5 + $0x168] sm:$0xff] %vm235_vm0, %v1221_v35  ;;  %v1155_v51 = vld [vmem:[#allocation2 + $0x190] sm:$0xff]  ;;  %v1194_v56 = vadd.f32 %v2101_v5, %v1123_v50  ;;  %v1121_v58 = vld [vmem:[#allocation2 + $0x80] sm:$0xff]  ;;  %1060 = vst.msk [vmem:[#allocation2 + $0xb0] sm:$0xff] %vm235_vm0, %v995_v44  ;;  %v996_v60 = vadd.f32 %v1532_v54, %v323_v42  ;;  %v1028_v61 = vadd.f32 %v1564_v55, %v355_v43  ;;  %v801_v62 = vpop.f32.mrb[23].mxu0  ;;  %v929_v63 = vpop.f32.mrb[23].mxu1 }
 0x153   : > { %v1226_v57 = vadd.f32 %v2101_v5, %v1155_v51  ;;  %v1153_v59 = vld [vmem:[#allocation2 + $0x180] sm:$0xff]  ;;  %1092 = vst.msk [vmem:[#allocation2 + $0x1b0] sm:$0xff] %vm235_vm0, %v1027_v45  ;;  %v1192_v0 = vadd.f32 %v2101_v5, %v1121_v58  ;;  %1058 = vst.msk [vmem:[#allocation2 + $0xa0] sm:$0xff] %vm235_vm0, %v993_v52  ;;  %v994_v4 = vadd.f32 %v801_v62, %v321_v48  ;;  %v362_v54 = vld [vmem:[#allocation2 + $0x1f0] sm:$0xff] }
 0x154   : > { %v1224_v1 = vadd.f32 %v2101_v5, %v1153_v59  ;;  %v1124_v2 = vld [vmem:[#allocation2 + $0x98] sm:$0xff]  ;;  %1090 = vst.msk [vmem:[#allocation2 + $0x1a0] sm:$0xff] %vm235_vm0, %v1025_v53  ;;  %v1026_v6 = vadd.f32 %v929_v63, %v353_v49  ;;  %1258 = vst.msk [vmem:[%s2106_s5 + $0x90] sm:$0xff] %vm235_vm0, %v1194_v56  ;;  %v330_v53 = vld [vmem:[#allocation2 + $0xf0] sm:$0xff] }
 0x155   : > { %v1156_v3 = vld [vmem:[#allocation2 + $0x198] sm:$0xff]  ;;  %1290 = vst.msk [vmem:[%s2106_s5 + $0x190] sm:$0xff] %vm235_vm0, %v1226_v57  ;;  %v1195_v7 = vadd.f32 %v2101_v5, %v1124_v2  ;;  %1061 = vst.msk [vmem:[#allocation2 + $0xb8] sm:$0xff] %vm235_vm0, %v996_v60  ;;  %v328_v55 = vld [vmem:[#allocation2 + $0xe0] sm:$0xff] }
 0x156   : > { %v1227_v8 = vadd.f32 %v2101_v5, %v1156_v3  ;;  %v1122_v9 = vld [vmem:[#allocation2 + $0x88] sm:$0xff]  ;;  %1093 = vst.msk [vmem:[#allocation2 + $0x1b8] sm:$0xff] %vm235_vm0, %v1028_v61  ;;  %1256 = vst.msk [vmem:[%s2106_s5 + $0x80] sm:$0xff] %vm235_vm0, %v1192_v0  ;;  %v360_v56 = vld [vmem:[#allocation2 + $0x1e0] sm:$0xff] }
 0x157   : > { %v1154_v10 = vld [vmem:[#allocation2 + $0x188] sm:$0xff]  ;;  %1288 = vst.msk [vmem:[%s2106_s5 + $0x180] sm:$0xff] %vm235_vm0, %v1224_v1  ;;  %v1193_v11 = vadd.f32 %v2101_v5, %v1122_v9  ;;  %1059 = vst.msk [vmem:[#allocation2 + $0xa8] sm:$0xff] %vm235_vm0, %v994_v4  ;;  %v1535_v17 = vpop.f32.mrb[24].mxu0  ;;  %v1567_v18 = vpop.f32.mrb[24].mxu1  ;;  %v331_v59 = vld [vmem:[#allocation2 + $0xf8] sm:$0xff] }
 0x158   : > { %v1225_v12 = vadd.f32 %v2101_v5, %v1154_v10  ;;  %1091 = vst.msk [vmem:[#allocation2 + $0x1a8] sm:$0xff] %vm235_vm0, %v1026_v6  ;;  %1259 = vst.msk [vmem:[%s2106_s5 + $0x98] sm:$0xff] %vm235_vm0, %v1195_v7  ;;  %v999_v21 = vadd.f32 %v1535_v17, %v326_v13  ;;  %v1031_v22 = vadd.f32 %v1567_v18, %v358_v14  ;;  %v814_v23 = vpop.f32.mrb[25].mxu0  ;;  %v942_v24 = vpop.f32.mrb[25].mxu1  ;;  %v363_v60 = vld [vmem:[#allocation2 + $0x1f8] sm:$0xff]  ;;  %v329_v1 = vld [vmem:[#allocation2 + $0xe8] sm:$0xff] }
 0x159   : > { %1291 = vst.msk [vmem:[%s2106_s5 + $0x198] sm:$0xff] %vm235_vm0, %v1227_v8  ;;  %1257 = vst.msk [vmem:[%s2106_s5 + $0x88] sm:$0xff] %vm235_vm0, %v1193_v11  ;;  %v1127_v27 = vld [vmem:[#allocation2 + $0xb0] sm:$0xff]  ;;  %v997_v29 = vadd.f32 %v814_v23, %v324_v15  ;;  %v1029_v30 = vadd.f32 %v942_v24, %v356_v16  ;;  %v1536_v31 = vpop.f32.mrb[26].mxu0  ;;  %v1568_v32 = vpop.f32.mrb[26].mxu1  ;;  %v361_v2 = vld [vmem:[#allocation2 + $0x1e8] sm:$0xff] }
 0x15a   : > { %1289 = vst.msk [vmem:[%s2106_s5 + $0x188] sm:$0xff] %vm235_vm0, %v1225_v12  ;;  %v1159_v28 = vld [vmem:[#allocation2 + $0x1b0] sm:$0xff]  ;;  %v1198_v33 = vadd.f32 %v2101_v5, %v1127_v27  ;;  %v1125_v35 = vld [vmem:[#allocation2 + $0xa0] sm:$0xff]  ;;  %1064 = vst.msk [vmem:[#allocation2 + $0xd0] sm:$0xff] %vm235_vm0, %v999_v21  ;;  %v1000_v37 = vadd.f32 %v1536_v31, %v327_v19  ;;  %v1032_v38 = vadd.f32 %v1568_v32, %v359_v20  ;;  %v817_v39 = vpop.f32.mrb[27].mxu0  ;;  %v945_v40 = vpop.f32.mrb[27].mxu1 }
 0x15b   : > { %v1230_v34 = vadd.f32 %v2101_v5, %v1159_v28  ;;  %v1157_v36 = vld [vmem:[#allocation2 + $0x1a0] sm:$0xff]  ;;  %1096 = vst.msk [vmem:[#allocation2 + $0x1d0] sm:$0xff] %vm235_vm0, %v1031_v22  ;;  %v1196_v41 = vadd.f32 %v2101_v5, %v1125_v35  ;;  %1062 = vst.msk [vmem:[#allocation2 + $0xc0] sm:$0xff] %vm235_vm0, %v997_v29  ;;  %v998_v45 = vadd.f32 %v817_v39, %v325_v25 }
 0x15c   : > { %v1228_v42 = vadd.f32 %v2101_v5, %v1157_v36  ;;  %v1128_v43 = vld [vmem:[#allocation2 + $0xb8] sm:$0xff]  ;;  %1094 = vst.msk [vmem:[#allocation2 + $0x1c0] sm:$0xff] %vm235_vm0, %v1029_v30  ;;  %v1030_v46 = vadd.f32 %v945_v40, %v357_v26  ;;  %1262 = vst.msk [vmem:[%s2106_s5 + $0xb0] sm:$0xff] %vm235_vm0, %v1198_v33 }
 0x15d   : > { %v1160_v44 = vld [vmem:[#allocation2 + $0x1b8] sm:$0xff]  ;;  %1294 = vst.msk [vmem:[%s2106_s5 + $0x1b0] sm:$0xff] %vm235_vm0, %v1230_v34  ;;  %v1199_v47 = vadd.f32 %v2101_v5, %v1128_v43  ;;  %1065 = vst.msk [vmem:[#allocation2 + $0xd8] sm:$0xff] %vm235_vm0, %v1000_v37 }
 0x15e   : > { %v1231_v48 = vadd.f32 %v2101_v5, %v1160_v44  ;;  %v1126_v49 = vld [vmem:[#allocation2 + $0xa8] sm:$0xff]  ;;  %1097 = vst.msk [vmem:[#allocation2 + $0x1d8] sm:$0xff] %vm235_vm0, %v1032_v38  ;;  %1260 = vst.msk [vmem:[%s2106_s5 + $0xa0] sm:$0xff] %vm235_vm0, %v1196_v41 }
 0x15f   : > { %v1158_v50 = vld [vmem:[#allocation2 + $0x1a8] sm:$0xff]  ;;  %1292 = vst.msk [vmem:[%s2106_s5 + $0x1a0] sm:$0xff] %vm235_vm0, %v1228_v42  ;;  %v1197_v51 = vadd.f32 %v2101_v5, %v1126_v49  ;;  %1063 = vst.msk [vmem:[#allocation2 + $0xc8] sm:$0xff] %vm235_vm0, %v998_v45  ;;  %v1539_v57 = vpop.f32.mrb[28].mxu0  ;;  %v1571_v58 = vpop.f32.mrb[28].mxu1 }
 0x160   : > { %v1229_v52 = vadd.f32 %v2101_v5, %v1158_v50  ;;  %1095 = vst.msk [vmem:[#allocation2 + $0x1c8] sm:$0xff] %vm235_vm0, %v1030_v46  ;;  %1263 = vst.msk [vmem:[%s2106_s5 + $0xb8] sm:$0xff] %vm235_vm0, %v1199_v47  ;;  %v1003_v61 = vadd.f32 %v1539_v57, %v330_v53  ;;  %v1035_v62 = vadd.f32 %v1571_v58, %v362_v54  ;;  %v830_v63 = vpop.f32.mrb[29].mxu0  ;;  %v958_v0 = vpop.f32.mrb[29].mxu1 }
 0x161   : > { %1295 = vst.msk [vmem:[%s2106_s5 + $0x1b8] sm:$0xff] %vm235_vm0, %v1231_v48  ;;  %1261 = vst.msk [vmem:[%s2106_s5 + $0xa8] sm:$0xff] %vm235_vm0, %v1197_v51  ;;  %v1131_v3 = vld [vmem:[#allocation2 + $0xd0] sm:$0xff]  ;;  %v1001_v6 = vadd.f32 %v830_v63, %v328_v55  ;;  %v1033_v7 = vadd.f32 %v958_v0, %v360_v56  ;;  %v1540_v8 = vpop.f32.mrb[30].mxu0  ;;  %v1572_v9 = vpop.f32.mrb[30].mxu1 }
 0x162   : > { %1293 = vst.msk [vmem:[%s2106_s5 + $0x1a8] sm:$0xff] %vm235_vm0, %v1229_v52  ;;  %v1163_v4 = vld [vmem:[#allocation2 + $0x1d0] sm:$0xff]  ;;  %v1202_v10 = vadd.f32 %v2101_v5, %v1131_v3  ;;  %v1129_v12 = vld [vmem:[#allocation2 + $0xc0] sm:$0xff]  ;;  %1068 = vst.msk [vmem:[#allocation2 + $0xf0] sm:$0xff] %vm235_vm0, %v1003_v61  ;;  %v1004_v14 = vadd.f32 %v1540_v8, %v331_v59  ;;  %v1036_v15 = vadd.f32 %v1572_v9, %v363_v60  ;;  %v833_v16 = vpop.f32.mrb[31].mxu0  ;;  %v961_v17 = vpop.f32.mrb[31].mxu1 }
 0x163   : > { %v1234_v11 = vadd.f32 %v2101_v5, %v1163_v4  ;;  %v1161_v13 = vld [vmem:[#allocation2 + $0x1c0] sm:$0xff]  ;;  %1100 = vst.msk [vmem:[#allocation2 + $0x1f0] sm:$0xff] %vm235_vm0, %v1035_v62  ;;  %v1200_v18 = vadd.f32 %v2101_v5, %v1129_v12  ;;  %1066 = vst.msk [vmem:[#allocation2 + $0xe0] sm:$0xff] %vm235_vm0, %v1001_v6  ;;  %v1002_v22 = vadd.f32 %v833_v16, %v329_v1 }
 0x164   : > { %v1232_v19 = vadd.f32 %v2101_v5, %v1161_v13  ;;  %v1132_v20 = vld [vmem:[#allocation2 + $0xd8] sm:$0xff]  ;;  %1098 = vst.msk [vmem:[#allocation2 + $0x1e0] sm:$0xff] %vm235_vm0, %v1033_v7  ;;  %v1034_v23 = vadd.f32 %v961_v17, %v361_v2  ;;  %1266 = vst.msk [vmem:[%s2106_s5 + $0xd0] sm:$0xff] %vm235_vm0, %v1202_v10 }
 0x165   : > { %v1164_v21 = vld [vmem:[#allocation2 + $0x1d8] sm:$0xff]  ;;  %1298 = vst.msk [vmem:[%s2106_s5 + $0x1d0] sm:$0xff] %vm235_vm0, %v1234_v11  ;;  %v1203_v24 = vadd.f32 %v2101_v5, %v1132_v20  ;;  %1069 = vst.msk [vmem:[#allocation2 + $0xf8] sm:$0xff] %vm235_vm0, %v1004_v14 }
 0x166   : > { %v1235_v25 = vadd.f32 %v2101_v5, %v1164_v21  ;;  %v1130_v26 = vld [vmem:[#allocation2 + $0xc8] sm:$0xff]  ;;  %1101 = vst.msk [vmem:[#allocation2 + $0x1f8] sm:$0xff] %vm235_vm0, %v1036_v15  ;;  %1264 = vst.msk [vmem:[%s2106_s5 + $0xc0] sm:$0xff] %vm235_vm0, %v1200_v18 }
 0x167   : > { %v1162_v27 = vld [vmem:[#allocation2 + $0x1c8] sm:$0xff]  ;;  %1296 = vst.msk [vmem:[%s2106_s5 + $0x1c0] sm:$0xff] %vm235_vm0, %v1232_v19  ;;  %v1201_v28 = vadd.f32 %v2101_v5, %v1130_v26  ;;  %1067 = vst.msk [vmem:[#allocation2 + $0xe8] sm:$0xff] %vm235_vm0, %v1002_v22 }
 0x168   : > { %v1233_v29 = vadd.f32 %v2101_v5, %v1162_v27  ;;  %1099 = vst.msk [vmem:[#allocation2 + $0x1e8] sm:$0xff] %vm235_vm0, %v1034_v23  ;;  %1267 = vst.msk [vmem:[%s2106_s5 + $0xd8] sm:$0xff] %vm235_vm0, %v1203_v24 }
 0x169   : > { %1299 = vst.msk [vmem:[%s2106_s5 + $0x1d8] sm:$0xff] %vm235_vm0, %v1235_v25  ;;  %1265 = vst.msk [vmem:[%s2106_s5 + $0xc8] sm:$0xff] %vm235_vm0, %v1201_v28  ;;  %v1135_v30 = vld [vmem:[#allocation2 + $0xf0] sm:$0xff] }
 0x16a   : > { %1297 = vst.msk [vmem:[%s2106_s5 + $0x1c8] sm:$0xff] %vm235_vm0, %v1233_v29  ;;  %v1167_v31 = vld [vmem:[#allocation2 + $0x1f0] sm:$0xff]  ;;  %v1206_v32 = vadd.f32 %v2101_v5, %v1135_v30  ;;  %v1133_v34 = vld [vmem:[#allocation2 + $0xe0] sm:$0xff] }
 0x16b   : > { %v1238_v33 = vadd.f32 %v2101_v5, %v1167_v31  ;;  %v1165_v35 = vld [vmem:[#allocation2 + $0x1e0] sm:$0xff]  ;;  %v1204_v36 = vadd.f32 %v2101_v5, %v1133_v34 }
 0x16c   : > { %v1236_v37 = vadd.f32 %v2101_v5, %v1165_v35  ;;  %v1136_v38 = vld [vmem:[#allocation2 + $0xf8] sm:$0xff]  ;;  %1270 = vst.msk [vmem:[%s2106_s5 + $0xf0] sm:$0xff] %vm235_vm0, %v1206_v32 }
 0x16d   : > { %v1168_v39 = vld [vmem:[#allocation2 + $0x1f8] sm:$0xff]  ;;  %1302 = vst.msk [vmem:[%s2106_s5 + $0x1f0] sm:$0xff] %vm235_vm0, %v1238_v33  ;;  %v1207_v40 = vadd.f32 %v2101_v5, %v1136_v38  ;;  %1268 = vst.msk [vmem:[%s2106_s5 + $0xe0] sm:$0xff] %vm235_vm0, %v1204_v36 }
 0x16e   : > { %v1239_v41 = vadd.f32 %v2101_v5, %v1168_v39  ;;  %v1134_v42 = vld [vmem:[#allocation2 + $0xe8] sm:$0xff]  ;;  %1300 = vst.msk [vmem:[%s2106_s5 + $0x1e0] sm:$0xff] %vm235_vm0, %v1236_v37 }
 0x16f   : > { %v1166_v43 = vld [vmem:[#allocation2 + $0x1e8] sm:$0xff]  ;;  %v1205_v44 = vadd.f32 %v2101_v5, %v1134_v42  ;;  %1271 = vst.msk [vmem:[%s2106_s5 + $0xf8] sm:$0xff] %vm235_vm0, %v1207_v40 }
 0x170   : > { %v1237_v45 = vadd.f32 %v2101_v5, %v1166_v43  ;;  %1303 = vst.msk [vmem:[%s2106_s5 + $0x1f8] sm:$0xff] %vm235_vm0, %v1239_v41 }
 0x171   : > { %1269 = vst.msk [vmem:[%s2106_s5 + $0xe8] sm:$0xff] %vm235_vm0, %v1205_v44 }
 0x172   : > { %1301 = vst.msk [vmem:[%s2106_s5 + $0x1e8] sm:$0xff] %vm235_vm0, %v1237_v45 }
 0x173 PF: > { %s16_s17 = sadd.s32 1, %s1767_s17   ;;  %s2382_s12 = smov %s1751_s13 }
 0x174   : > { %p13_p9 = scmp.ge.s32.totalorder %s16_s17, 6   ;;  %s2383_s13 = smov %s1755_s14 }
 0x175   : > { %s2384_s14 = smov %s1842_s24  ;;  %s2385_s15 = smov %s1763_s16 }
 0x176   : > { %s2386_s16 = smov %s2388_s19  ;;  %15 = sbr.rel (!%p13_p9) target bundleno = 4 (0x4), region = 83 }
 0x17d   :  { %1326 = vsyncpa [#allocation4], 1 }
 0x17e   :  { %1328 = vsyncpa [#allocation4 + $0x1], 1 }

</bundles_post_ra>
